<compile_context>
chip_gen: v7x
topology: tpu7x:2x2x1
jax: 0.10.0
libtpu: 0.0.40
codegen_flags: <defaults>
</compile_context>

<pallas_src>
import functools
import math

import jax
import jax.numpy as jnp
from jax import lax
from jax.experimental import pallas as pl
from jax.experimental.pallas import tpu as pltpu

# ArcFace-style CombinedMarginLoss hyper-parameters (m1 == 1.0, m3 == 0.0 branch).
S = 64.0
M2 = 0.5
COS_M2 = math.cos(M2)
SIN_M2 = math.sin(M2)
EPS_NORM_SQ = 1e-24                 # (torch normalize eps=1e-12)^2, applied to sum-of-squares
EPS_LOG = 1e-30                     # DistCrossEntropyFunc clamp_min
MAX_ROW_LOSS = -math.log(EPS_LOG)   # ~69.0776, per-row loss cap implied by the clamp
NEG_INIT = -2.0 * S                 # finite init for the running max (any real z >= -S)
NEG_MASK = -1.0e30                  # "minus infinity" for excluded (target / padded) classes


def _round_up(x, m):
    return (x + m - 1) // m * m


def _calc_loss_kernel(emb_ref, w_ref, lab_ref, out_ref,
                      nemb_scr, m_scr, l_scr, t_scr,
                      *, num_classes, c_tile, needs_mask, batch):
    j = pl.program_id(0)
    labels = lab_ref[...]                                    # (B, 1) int32

    # --- one-time init: normalize embeddings (f32 math, stored in compute dtype), reset acc ---
    @pl.when(j == 0)
    def _init():
        emb = emb_ref[...].astype(jnp.float32)               # (B, E), done once (B small)
        inv = lax.rsqrt(jnp.maximum(jnp.sum(emb * emb, axis=-1, keepdims=True), EPS_NORM_SQ))
        nemb_scr[...] = (emb * inv).astype(nemb_scr.dtype)
        m_scr[...] = jnp.full(m_scr.shape, NEG_INIT, jnp.float32)
        l_scr[...] = jnp.zeros(l_scr.shape, jnp.float32)
        t_scr[...] = jnp.zeros(t_scr.shape, jnp.float32)

    # --- per class-tile: raw bf16 MXU matmul; norms folded into a (B, Ct) post-matmul scale ---
    w = w_ref[...]                                            # (Ct, E), streamed dtype (bf16)

    # per-class sum-of-squares via MXU mat-vec -> (1, Ct), already lane-oriented for the scale
    ones_row = jnp.ones((1, w.shape[1]), dtype=w.dtype)
    w_sq_sum = lax.dot_general(
        ones_row, w * w,
        dimension_numbers=(((1,), (1,)), ((), ())),
        preferred_element_type=jnp.float32)
    w_inv = lax.rsqrt(jnp.maximum(w_sq_sum, EPS_NORM_SQ))     # (1, Ct) f32

    raw = lax.dot_general(                                    # (B, Ct) = nemb @ w.T (f32 acc)
        nemb_scr[...], w,
        dimension_numbers=(((1,), (1,)), ((), ())),
        preferred_element_type=jnp.float32)
    cos = jnp.clip(raw * w_inv, -1.0, 1.0)                    # cosine logits, clamp(-1, 1)

    cls = lax.broadcasted_iota(jnp.int32, (batch, c_tile), 1) + j * c_tile
    one_hot = (cls == labels) & (labels != -1)                # (B, Ct)
    # gather the target cosine (unmargined) into a (B, 1) accumulator
    t_scr[...] += jnp.sum(jnp.where(one_hot, cos, 0.0), axis=-1, keepdims=True)

    z = cos * jnp.float32(S)
    # exclude the target (added back, margined, at finalize) and any padded classes
    exclude = one_hot
    if needs_mask:
        exclude = exclude | (cls >= num_classes)
    z_nt = jnp.where(exclude, NEG_MASK, z)

    m_prev = m_scr[...]
    m_new = jnp.maximum(m_prev, jnp.max(z_nt, axis=-1, keepdims=True))
    l_scr[...] = (l_scr[...] * jnp.exp(m_prev - m_new)
                  + jnp.sum(jnp.exp(z_nt - m_new), axis=-1, keepdims=True))
    m_scr[...] = m_new

    # --- finalize: add margined target term to the denominator, reduce the mean loss ---
    @pl.when(j == pl.num_programs(0) - 1)
    def _finalize():
        valid = labels != -1                                  # (B, 1)
        cos_t = t_scr[...]
        sin_t = jnp.sqrt(jnp.maximum(1.0 - cos_t * cos_t, 0.0))
        cos_marg = cos_t * jnp.float32(COS_M2) - sin_t * jnp.float32(SIN_M2)  # cos(theta + m2)
        z_t = cos_marg * jnp.float32(S)
        m = m_scr[...]
        m_fin = jnp.maximum(m, z_t)
        denom = l_scr[...] * jnp.exp(m - m_fin) + jnp.exp(z_t - m_fin)
        neg_log_p = m_fin + jnp.log(denom) - z_t              # -log(p_target) for valid rows
        loss_rows = jnp.where(valid,
                              jnp.minimum(neg_log_p, MAX_ROW_LOSS),   # clamp_min(p, 1e-30)
                              MAX_ROW_LOSS)                            # label == -1 rows
        out_ref[0, 0] = jnp.sum(loss_rows) * jnp.float32(1.0 / batch)


def calc_loss(local_embeddings, weight, local_labels, *,
              c_tile=8192, compute_dtype=jnp.bfloat16):
    """local_embeddings: (B, E), weight: (C, E), local_labels: (B,) int32 (-1 = no label).

    compute_dtype: dtype for the HBM stream / MXU operands (default bf16 — halves HBM bytes on
    an HBM-bound kernel).  All normalization / LSE / loss math stays in f32 in-kernel.
    Callers that already hold bf16 weights avoid the wrapper-side cast entirely.
    """
    emb = local_embeddings
    w = weight
    if compute_dtype is not None:
        emb = emb.astype(compute_dtype)
        w = w.astype(compute_dtype)

    B, E = emb.shape
    C, _ = w.shape
    labels2d = local_labels.reshape(B, 1).astype(jnp.int32)

    # lane-aligned class tile; pad C up to a tile multiple (padded classes are masked in-kernel)
    c_tile = min(_round_up(c_tile, 128), _round_up(C, 128))
    c_padded = _round_up(C, c_tile)
    if c_padded != C:
        w = jnp.pad(w, ((0, c_padded - C), (0, 0)))
    num_tiles = c_padded // c_tile

    kernel = functools.partial(
        _calc_loss_kernel,
        num_classes=C, c_tile=c_tile, needs_mask=(c_padded != C), batch=B)

    # Explicit scoped-VMEM budget: double-buffered weight tiles + embedding buffers +
    # normalized-embedding scratch + (B, Ct) f32 temporaries + headroom.
    w_isz = jnp.dtype(w.dtype).itemsize
    e_isz = jnp.dtype(emb.dtype).itemsize
    vmem_bytes = (2 * c_tile * E * w_isz        # streamed weight tiles (double buffered)
                  + 2 * B * E * e_isz           # embedding input buffers
                  + B * E * e_isz               # normalized-embedding scratch
                  + 6 * B * c_tile * 4          # (B, Ct) f32 temporaries headroom
                  + (2 << 20))                  # misc headroom
    vmem_limit = min(max(vmem_bytes, 32 << 20), 64 << 20)   # keep within v7x's 64 MiB

    out = pl.pallas_call(
        kernel,
        out_shape=jax.ShapeDtypeStruct((1, 1), jnp.float32),
        grid_spec=pltpu.PrefetchScalarGridSpec(
            num_scalar_prefetch=0,
            grid=(num_tiles,),
            in_specs=[
                pl.BlockSpec((B, E), lambda j: (0, 0)),        # embeddings (fetched once)
                pl.BlockSpec((c_tile, E), lambda j: (j, 0)),   # streamed weight tiles
                pl.BlockSpec((B, 1), lambda j: (0, 0)),        # labels
            ],
            out_specs=pl.BlockSpec(memory_space=pltpu.SMEM),
            scratch_shapes=[
                pltpu.VMEM((B, E), emb.dtype),     # normalized embeddings (compute dtype)
                pltpu.VMEM((B, 1), jnp.float32),   # running max (non-target)
                pltpu.VMEM((B, 1), jnp.float32),   # running sum-exp (non-target)
                pltpu.VMEM((B, 1), jnp.float32),   # gathered target cosine
            ],
        ),
        compiler_params=pltpu.CompilerParams(
            dimension_semantics=("arbitrary",),    # class axis is a reduction
            vmem_limit_bytes=vmem_limit,
        ),
    )(emb, w, labels2d)
    return out[0, 0]


def calc_loss_reference(local_embeddings, weight, local_labels):
    """Pure-JAX reference mirroring the PyTorch module (single-device DistCrossEntropy)."""
    emb = local_embeddings.astype(jnp.float32)
    w = weight.astype(jnp.float32)
    nemb = emb / jnp.maximum(jnp.linalg.norm(emb, axis=-1, keepdims=True), 1e-12)
    nw = w / jnp.maximum(jnp.linalg.norm(w, axis=-1, keepdims=True), 1e-12)
    logits = jnp.clip(jnp.dot(nemb, nw.T, precision=lax.Precision.HIGHEST), -1.0, 1.0)
    labels = local_labels.reshape(-1, 1)
    valid = labels != -1
    one_hot = (jnp.arange(logits.shape[1])[None, :] == labels) & valid
    target = logits * COS_M2 - jnp.sqrt(jnp.maximum(1 - logits ** 2, 0.0)) * SIN_M2
    logits = jnp.where(one_hot, target, logits) * S
    logits = logits - jnp.max(logits, axis=-1, keepdims=True)
    probs = jnp.exp(logits) / jnp.sum(jnp.exp(logits), axis=-1, keepdims=True)
    p = jnp.where(valid, jnp.sum(jnp.where(one_hot, probs, 0.0), axis=-1, keepdims=True), 0.0)
    return -jnp.mean(jnp.log(jnp.maximum(p, EPS_LOG)))


if __name__ == "__main__":
    # small shapes; C deliberately not a multiple of the tile to exercise padding/masking,
    # and c_tile=128 so the grid has multiple class tiles (online-LSE path).
    B, E, C = 8, 128, 300  # batch, embedding_size, num_classes

    key = jax.random.PRNGKey(0)
    k_emb, k_w, k_lab = jax.random.split(key, 3)

    local_embeddings = jax.random.normal(k_emb, (B, E), dtype=jnp.float32)
    weight = 0.01 * jax.random.normal(k_w, (C, E), dtype=jnp.float32)  # torch.normal(0, 0.01, (C, E))
    local_labels = jax.random.randint(k_lab, (B,), 0, C, dtype=jnp.int32)
    local_labels = local_labels.at[-1].set(-1)   # exercise the "no label" (-1) path

    ref = jax.block_until_ready(calc_loss_reference(local_embeddings, weight, local_labels))

    # f32-streaming path (tighter check of the kernel math itself).
    loss_f32 = jax.block_until_ready(
        calc_loss(local_embeddings, weight, local_labels, c_tile=128, compute_dtype=jnp.float32))
    assert jnp.isfinite(loss_f32), "kernel (f32) produced non-finite loss"
    assert abs(float(loss_f32) - float(ref)) <= 1e-2 * (1.0 + abs(float(ref))), (
        f"f32 mismatch: kernel={float(loss_f32)} ref={float(ref)}")

    # default bf16-streaming path (what production should use; looser tolerance).
    loss_bf16 = jax.block_until_ready(
        calc_loss(local_embeddings, weight, local_labels, c_tile=128))
    assert jnp.isfinite(loss_bf16), "kernel (bf16) produced non-finite loss"
    assert abs(float(loss_bf16) - float(ref)) <= 3e-2 * (1.0 + abs(float(ref))), (
        f"bf16 mismatch: kernel={float(loss_bf16)} ref={float(ref)}")

    print("KERNEL_OK")
</pallas_src>

<mosaic_0001>
module attributes {stable_mosaic.version = 11 : i64} {
  func.func @_calc_loss_kernel(%arg0: i32, %arg1: memref<8x128xf32, #tpu.memory_space<vmem>>, %arg2: memref<128x128xf32, #tpu.memory_space<vmem>>, %arg3: memref<8x1xi32, #tpu.memory_space<vmem>>, %arg4: memref<1x1xf32, #tpu.memory_space<smem>>, %arg5: memref<8x128xf32, #tpu.memory_space<vmem>>, %arg6: memref<8x1xf32, #tpu.memory_space<vmem>>, %arg7: memref<8x1xf32, #tpu.memory_space<vmem>>, %arg8: memref<8x1xf32, #tpu.memory_space<vmem>>) attributes {dimension_semantics = [#tpu.dimension_semantics<arbitrary>], iteration_bounds = array<i64: 3>, scalar_prefetch = 0 : i64, scratch_operands = 4 : i64, tpu.core_type = #tpu.core_type<tc>, window_params = [{pipeline_mode = #tpu.pipeline_mode<synchronous>, transform_indices = @transform_0, window_bounds = array<i64: 8, 128>}, {transform_indices = @transform_1, window_bounds = array<i64: 128, 128>}, {pipeline_mode = #tpu.pipeline_mode<synchronous>, transform_indices = @transform_2, window_bounds = array<i64: 8, 1>}, {transform_indices = @transform_3, window_bounds = array<i64: 1, 1>}]} {
    %c0 = arith.constant 0 : index
    %c0_0 = arith.constant 0 : index
    %0 = vector.load %arg3[%c0, %c0_0] : memref<8x1xi32, #tpu.memory_space<vmem>>, vector<8x1xi32>
    %c0_i32 = arith.constant 0 : i32
    %1 = arith.cmpi eq, %arg0, %c0_i32 : i32
    %2 = arith.extui %1 : i1 to i32
    %c0_i32_1 = arith.constant 0 : i32
    %3 = arith.cmpi ne, %2, %c0_i32_1 : i32
    scf.if %3 {
      %c0_30 = arith.constant 0 : index
      %c0_31 = arith.constant 0 : index
      %62 = vector.load %arg1[%c0_30, %c0_31] : memref<8x128xf32, #tpu.memory_space<vmem>>, vector<8x128xf32>
      %63 = arith.mulf %62, %62 : vector<8x128xf32>
      %cst_32 = arith.constant dense<0.000000e+00> : vector<8xf32>
      %64 = vector.multi_reduction <add>, %63, %cst_32 [1] : vector<8x128xf32> to vector<8xf32>
      %65 = vector.shape_cast %64 : vector<8xf32> to vector<8x1xf32>
      %cst_33 = arith.constant 1.000000e-24 : f32
      %66 = vector.broadcast %cst_33 : f32 to vector<8x1xf32>
      %67 = arith.maximumf %65, %66 : vector<8x1xf32>
      %68 = math.rsqrt %67 : vector<8x1xf32>
      %69 = vector.broadcast %68 : vector<8x1xf32> to vector<8x128xf32>
      %70 = arith.mulf %62, %69 : vector<8x128xf32>
      %c0_34 = arith.constant 0 : index
      %c0_35 = arith.constant 0 : index
      %71 = vector.load %arg5[%c0_34, %c0_35] : memref<8x128xf32, #tpu.memory_space<vmem>>, vector<8x128xf32>
      tpu.vector_store %arg5[%c0_34, %c0_35], %70 {strides = array<i32>} : memref<8x128xf32, #tpu.memory_space<vmem>>, vector<8x128xf32>,
      %cst_36 = arith.constant -1.280000e+02 : f32
      %72 = vector.broadcast %cst_36 : f32 to vector<8x1xf32>
      %c0_37 = arith.constant 0 : index
      %c0_38 = arith.constant 0 : index
      %73 = vector.load %arg6[%c0_37, %c0_38] : memref<8x1xf32, #tpu.memory_space<vmem>>, vector<8x1xf32>
      tpu.vector_store %arg6[%c0_37, %c0_38], %72 {strides = array<i32>} : memref<8x1xf32, #tpu.memory_space<vmem>>, vector<8x1xf32>,
      %cst_39 = arith.constant 0.000000e+00 : f32
      %74 = vector.broadcast %cst_39 : f32 to vector<8x1xf32>
      %c0_40 = arith.constant 0 : index
      %c0_41 = arith.constant 0 : index
      %75 = vector.load %arg7[%c0_40, %c0_41] : memref<8x1xf32, #tpu.memory_space<vmem>>, vector<8x1xf32>
      tpu.vector_store %arg7[%c0_40, %c0_41], %74 {strides = array<i32>} : memref<8x1xf32, #tpu.memory_space<vmem>>, vector<8x1xf32>,
      %cst_42 = arith.constant 0.000000e+00 : f32
      %76 = vector.broadcast %cst_42 : f32 to vector<8x1xf32>
      %c0_43 = arith.constant 0 : index
      %c0_44 = arith.constant 0 : index
      %77 = vector.load %arg8[%c0_43, %c0_44] : memref<8x1xf32, #tpu.memory_space<vmem>>, vector<8x1xf32>
      tpu.vector_store %arg8[%c0_43, %c0_44], %76 {strides = array<i32>} : memref<8x1xf32, #tpu.memory_space<vmem>>, vector<8x1xf32>,
    } else {
    }
    %c0_2 = arith.constant 0 : index
    %c0_3 = arith.constant 0 : index
    %4 = vector.load %arg2[%c0_2, %c0_3] : memref<128x128xf32, #tpu.memory_space<vmem>>, vector<128x128xf32>
    %cst = arith.constant 1.000000e+00 : f32
    %5 = vector.broadcast %cst : f32 to vector<1x128xf32>
    %6 = arith.mulf %4, %4 : vector<128x128xf32>
    %cst_4 = arith.constant dense<0.000000e+00> : vector<1x128xf32>
    %7 = tpu.matmul %5, %6, %cst_4 {dimension_numbers = #tpu.dot_dimension_numbers<[1], [1], [0], [0], [0, 0, 1, 0], [], []>} : vector<1x128xf32>, vector<128x128xf32>, vector<1x128xf32> -> vector<1x128xf32>
    %cst_5 = arith.constant 1.000000e-24 : f32
    %8 = vector.broadcast %cst_5 : f32 to vector<1x128xf32>
    %9 = arith.maximumf %7, %8 : vector<1x128xf32>
    %10 = math.rsqrt %9 : vector<1x128xf32>
    %c0_6 = arith.constant 0 : index
    %c0_7 = arith.constant 0 : index
    %11 = vector.load %arg5[%c0_6, %c0_7] : memref<8x128xf32, #tpu.memory_space<vmem>>, vector<8x128xf32>
    %cst_8 = arith.constant dense<0.000000e+00> : vector<8x128xf32>
    %12 = tpu.matmul %11, %4, %cst_8 {dimension_numbers = #tpu.dot_dimension_numbers<[1], [1], [0], [0], [0, 0, 1, 0], [], []>} : vector<8x128xf32>, vector<128x128xf32>, vector<8x128xf32> -> vector<8x128xf32>
    %13 = vector.broadcast %10 : vector<1x128xf32> to vector<8x128xf32>
    %14 = arith.mulf %12, %13 : vector<8x128xf32>
    %cst_9 = arith.constant -1.000000e+00 : f32
    %cst_10 = arith.constant 1.000000e+00 : f32
    %15 = vector.broadcast %cst_9 : f32 to vector<8x128xf32>
    %16 = arith.maximumf %15, %14 : vector<8x128xf32>
    %17 = vector.broadcast %cst_10 : f32 to vector<8x128xf32>
    %18 = arith.minimumf %17, %16 : vector<8x128xf32>
    %19 = tpu.iota {dimensions = array<i32: 1>} : vector<8x128xi32>
    %c128_i32 = arith.constant 128 : i32
    %20 = arith.muli %arg0, %c128_i32 : i32
    %21 = vector.broadcast %20 : i32 to vector<8x128xi32>
    %22 = arith.addi %19, %21 : vector<8x128xi32>
    %23 = vector.broadcast %0 : vector<8x1xi32> to vector<8x128xi32>
    %24 = arith.cmpi eq, %22, %23 : vector<8x128xi32>
    %c-1_i32 = arith.constant -1 : i32
    %25 = vector.broadcast %c-1_i32 : i32 to vector<8x1xi32>
    %26 = arith.cmpi ne, %0, %25 : vector<8x1xi32>
    %27 = vector.broadcast %26 : vector<8x1xi1> to vector<8x128xi1>
    %28 = arith.andi %24, %27 : vector<8x128xi1>
    %c0_11 = arith.constant 0 : index
    %c0_12 = arith.constant 0 : index
    %29 = vector.load %arg8[%c0_11, %c0_12] : memref<8x1xf32, #tpu.memory_space<vmem>>, vector<8x1xf32>
    %cst_13 = arith.constant 0.000000e+00 : f32
    %30 = vector.broadcast %cst_13 : f32 to vector<8x128xf32>
    %31 = arith.select %28, %18, %30 : vector<8x128xi1>, vector<8x128xf32>
    %cst_14 = arith.constant dense<0.000000e+00> : vector<8xf32>
    %32 = vector.multi_reduction <add>, %31, %cst_14 [1] : vector<8x128xf32> to vector<8xf32>
    %33 = vector.shape_cast %32 : vector<8xf32> to vector<8x1xf32>
    %34 = arith.addf %29, %33 : vector<8x1xf32>
    %c0_15 = arith.constant 0 : index
    %c0_16 = arith.constant 0 : index
    %35 = vector.load %arg8[%c0_15, %c0_16] : memref<8x1xf32, #tpu.memory_space<vmem>>, vector<8x1xf32>
    tpu.vector_store %arg8[%c0_15, %c0_16], %34 {strides = array<i32>} : memref<8x1xf32, #tpu.memory_space<vmem>>, vector<8x1xf32>,
    %cst_17 = arith.constant 6.400000e+01 : f32
    %36 = vector.broadcast %cst_17 : f32 to vector<8x128xf32>
    %37 = arith.mulf %18, %36 : vector<8x128xf32>
    %c300_i32 = arith.constant 300 : i32
    %38 = vector.broadcast %c300_i32 : i32 to vector<8x128xi32>
    %39 = arith.cmpi sge, %22, %38 : vector<8x128xi32>
    %40 = arith.ori %28, %39 : vector<8x128xi1>
    %cst_18 = arith.constant -1.000000e+30 : f32
    %41 = vector.broadcast %cst_18 : f32 to vector<8x128xf32>
    %42 = arith.select %40, %41, %37 : vector<8x128xi1>, vector<8x128xf32>
    %c0_19 = arith.constant 0 : index
    %c0_20 = arith.constant 0 : index
    %43 = vector.load %arg6[%c0_19, %c0_20] : memref<8x1xf32, #tpu.memory_space<vmem>>, vector<8x1xf32>
    %cst_21 = arith.constant dense<0xFF800000> : vector<8xf32>
    %44 = vector.multi_reduction <maximumf>, %42, %cst_21 [1] : vector<8x128xf32> to vector<8xf32>
    %45 = vector.shape_cast %44 : vector<8xf32> to vector<8x1xf32>
    %46 = arith.maximumf %43, %45 : vector<8x1xf32>
    %c0_22 = arith.constant 0 : index
    %c0_23 = arith.constant 0 : index
    %47 = vector.load %arg7[%c0_22, %c0_23] : memref<8x1xf32, #tpu.memory_space<vmem>>, vector<8x1xf32>
    %48 = arith.subf %43, %46 : vector<8x1xf32>
    %49 = math.exp %48 : vector<8x1xf32>
    %50 = arith.mulf %47, %49 : vector<8x1xf32>
    %51 = vector.broadcast %46 : vector<8x1xf32> to vector<8x128xf32>
    %52 = arith.subf %42, %51 : vector<8x128xf32>
    %53 = math.exp %52 : vector<8x128xf32>
    %cst_24 = arith.constant dense<0.000000e+00> : vector<8xf32>
    %54 = vector.multi_reduction <add>, %53, %cst_24 [1] : vector<8x128xf32> to vector<8xf32>
    %55 = vector.shape_cast %54 : vector<8xf32> to vector<8x1xf32>
    %56 = arith.addf %50, %55 : vector<8x1xf32>
    %c0_25 = arith.constant 0 : index
    %c0_26 = arith.constant 0 : index
    %57 = vector.load %arg7[%c0_25, %c0_26] : memref<8x1xf32, #tpu.memory_space<vmem>>, vector<8x1xf32>
    tpu.vector_store %arg7[%c0_25, %c0_26], %56 {strides = array<i32>} : memref<8x1xf32, #tpu.memory_space<vmem>>, vector<8x1xf32>,
    %c0_27 = arith.constant 0 : index
    %c0_28 = arith.constant 0 : index
    %58 = vector.load %arg6[%c0_27, %c0_28] : memref<8x1xf32, #tpu.memory_space<vmem>>, vector<8x1xf32>
    tpu.vector_store %arg6[%c0_27, %c0_28], %46 {strides = array<i32>} : memref<8x1xf32, #tpu.memory_space<vmem>>, vector<8x1xf32>,
    %c2_i32 = arith.constant 2 : i32
    %59 = arith.cmpi eq, %arg0, %c2_i32 : i32
    %60 = arith.extui %59 : i1 to i32
    %c0_i32_29 = arith.constant 0 : i32
    %61 = arith.cmpi ne, %60, %c0_i32_29 : i32
    scf.if %61 {
      %c-1_i32_30 = arith.constant -1 : i32
      %62 = vector.broadcast %c-1_i32_30 : i32 to vector<8x1xi32>
      %63 = arith.cmpi ne, %0, %62 : vector<8x1xi32>
      %c0_31 = arith.constant 0 : index
      %c0_32 = arith.constant 0 : index
      %64 = vector.load %arg8[%c0_31, %c0_32] : memref<8x1xf32, #tpu.memory_space<vmem>>, vector<8x1xf32>
      %65 = arith.mulf %64, %64 : vector<8x1xf32>
      %cst_33 = arith.constant 1.000000e+00 : f32
      %66 = vector.broadcast %cst_33 : f32 to vector<8x1xf32>
      %67 = arith.subf %66, %65 : vector<8x1xf32>
      %cst_34 = arith.constant 0.000000e+00 : f32
      %68 = vector.broadcast %cst_34 : f32 to vector<8x1xf32>
      %69 = arith.maximumf %67, %68 : vector<8x1xf32>
      %70 = math.sqrt %69 : vector<8x1xf32>
      %cst_35 = arith.constant 0.87758255 : f32
      %71 = vector.broadcast %cst_35 : f32 to vector<8x1xf32>
      %72 = arith.mulf %64, %71 : vector<8x1xf32>
      %cst_36 = arith.constant 0.47942555 : f32
      %73 = vector.broadcast %cst_36 : f32 to vector<8x1xf32>
      %74 = arith.mulf %70, %73 : vector<8x1xf32>
      %75 = arith.subf %72, %74 : vector<8x1xf32>
      %cst_37 = arith.constant 6.400000e+01 : f32
      %76 = vector.broadcast %cst_37 : f32 to vector<8x1xf32>
      %77 = arith.mulf %75, %76 : vector<8x1xf32>
      %c0_38 = arith.constant 0 : index
      %c0_39 = arith.constant 0 : index
      %78 = vector.load %arg6[%c0_38, %c0_39] : memref<8x1xf32, #tpu.memory_space<vmem>>, vector<8x1xf32>
      %79 = arith.maximumf %78, %77 : vector<8x1xf32>
      %c0_40 = arith.constant 0 : index
      %c0_41 = arith.constant 0 : index
      %80 = vector.load %arg7[%c0_40, %c0_41] : memref<8x1xf32, #tpu.memory_space<vmem>>, vector<8x1xf32>
      %81 = arith.subf %78, %79 : vector<8x1xf32>
      %82 = math.exp %81 : vector<8x1xf32>
      %83 = arith.mulf %80, %82 : vector<8x1xf32>
      %84 = arith.subf %77, %79 : vector<8x1xf32>
      %85 = math.exp %84 : vector<8x1xf32>
      %86 = arith.addf %83, %85 : vector<8x1xf32>
      %87 = math.log %86 : vector<8x1xf32>
      %88 = arith.addf %79, %87 : vector<8x1xf32>
      %89 = arith.subf %88, %77 : vector<8x1xf32>
      %cst_42 = arith.constant 69.0775528 : f32
      %90 = vector.broadcast %cst_42 : f32 to vector<8x1xf32>
      %91 = arith.minimumf %89, %90 : vector<8x1xf32>
      %cst_43 = arith.constant 69.0775528 : f32
      %92 = vector.broadcast %cst_43 : f32 to vector<8x1xf32>
      %93 = arith.select %63, %91, %92 : vector<8x1xi1>, vector<8x1xf32>
      %94 = vector.shape_cast %93 : vector<8x1xf32> to vector<1x8x1xf32>
      %cst_44 = arith.constant dense<0.000000e+00> : vector<1xf32>
      %95 = vector.multi_reduction <add>, %94, %cst_44 [1, 2] : vector<1x8x1xf32> to vector<1xf32>
      %96 = vector.shape_cast %95 : vector<1xf32> to vector<1x1x1xf32>
      %97 = vector.extract %96[0, 0, 0] : f32 from vector<1x1x1xf32>
      %cst_45 = arith.constant 1.250000e-01 : f32
      %98 = arith.mulf %97, %cst_45 : f32
      %c0_46 = arith.constant 0 : index
      %c0_47 = arith.constant 0 : index
      %99 = memref.load %arg4[%c0_46, %c0_47] : memref<1x1xf32, #tpu.memory_space<smem>>
      memref.store %98, %arg4[%c0_46, %c0_47] : memref<1x1xf32, #tpu.memory_space<smem>>
    } else {
    }
    return
  }
  func.func @transform_0(%arg0: i32) -> (i32, i32) {
    %c0_i32 = arith.constant 0 : i32
    %c0_i32_0 = arith.constant 0 : i32
    %c0_i32_1 = arith.constant 0 : i32
    return %c0_i32, %c0_i32_0 : i32, i32
  }
  func.func @transform_1(%arg0: i32) -> (i32, i32) {
    %c0_i32 = arith.constant 0 : i32
    %c0_i32_0 = arith.constant 0 : i32
    return %arg0, %c0_i32 : i32, i32
  }
  func.func @transform_2(%arg0: i32) -> (i32, i32) {
    %c0_i32 = arith.constant 0 : i32
    %c0_i32_0 = arith.constant 0 : i32
    %c0_i32_1 = arith.constant 0 : i32
    return %c0_i32, %c0_i32_0 : i32, i32
  }
  func.func @transform_3(%arg0: i32) -> (i32, i32) {
    %c0_i32 = arith.constant 0 : i32
    %c0_i32_0 = arith.constant 0 : i32
    %c0_i32_1 = arith.constant 0 : i32
    return %c0_i32, %c0_i32_0 : i32, i32
  }
}

</mosaic_0001>

<bundles_post_ra>
// kernel: tpu_custom_call.1
= control target key start
LH: loop header
LB: loop body
LE: loop exit
PB: predicated region body
PF: predicated region fallthrough
CT: control target
= control target key end

     0   :  { %8 = vsyncpa [#allocation7], 0  ;;  %s1059_s0 = inlined_call_operand.vmem [shape: f32[8,128], index: 0, kind: input, shape index: {}]   ;;  %s1060_s1 = inlined_call_operand.hbm [shape: f32[384,128], index: 1, kind: input, shape index: {}]   ;;  %s1061_s2 = inlined_call_operand.vmem [shape: s32[8,1], index: 2, kind: input, shape index: {}]   ;;  %s1062_s3 = inlined_call_operand.hbm [shape: f32[1,1], index: 3, kind: output, shape index: {}]  }
   0x1   :  { %10 = vsyncpa [#allocation7 + $0x1], 0 }
   0x2   :  { %11 = vsyncpa [#allocation8], 0  ;;  %s888_s12 = smov 0   ;;  %s890_s13 = smov 0  }
   0x3   :  { %s892_s14 = smov 0   ;;  %s894_s15 = smov 0  }
   0x4 LB: > { %s907_s16 = sadd.s32 4294967295, %s855_s15   ;;  %s910_s17 = sadd.s32 1, %s855_s15   ;;  %s855_s15 = sphi %s894_s15, %s1069_s15   ;;  %s851_s14 = sphi %s892_s14, %s1068_s14   ;;  %s847_s13 = sphi %s890_s13, %s1067_s13   ;;  %s843_s12 = sphi %s888_s12, %s1066_s12  }
   0x5   : > { %s42_s18 = ssub.s32 %s855_s15, %s910_s17  ;;  %s45_s19 = sadd.s32 1, %s851_s14 }
   0x6   : > { %p43_p0 = scmp.eq.s32.totalorder %s42_s18, 0  ;;  %p52_p1 = scmp.ne.s32.totalorder %s851_s14, %s847_s13 }
   0x7   : > { %p53_p2 = scmp.eq.s32.totalorder %s855_s15, 0  ;;  %p58_p3 = scmp.ne.s32.totalorder %s847_s13, %s843_s12 }
   0x8   : > { %s920_s20 = scalar_select %p43_p0, %s851_s14, %s45_s19  }
   0x9   : > { %p54_p4 = por %p53_p2, %p52_p1  ;;  %p59_p5 = scmp.eq.s32.totalorder %s907_s16, 0 }
   0xa   : > { %p712_p6 = scmp.lt.s32.totalorder %s855_s15, 3  ;;  %s130_s22 = sand.u32 1, %s851_s14  }
   0xb   : > { %p924_p7 = por %p59_p5, %p58_p3  ;;  %s534_s23 = sshll.u32 %s130_s22, 7 }
   0xc   : > { %s547_s24 = sshll.u32 %s855_s15, 11  ;;  %s134_s28 = scalar_lea.vmem [#allocation6], %s534_s23 }
   0xd   : > { %s933_s27 = scalar_lea.hbm %s1060_s1, %s547_s24  ;;  %s141_s29 = sshll.u32 %s134_s28, 4  ;;  %s935_s29 = int_to_ptr.vmem [resolvable:$true] %s141_s29 }
   0xe   : > { %p937_p8 = pnand %p712_p6, %p54_p4  ;;  %s942_s4 = scalar_lea.sflag [#allocation7], %s130_s22 }
   0xf   : > { %s775_s5 = scalar_lea.hbm %s933_s27, 2048  ;;  %s780_s8 = scalar_lea.hbm %s1060_s1, 6144 }
  0x10   : > { %p776_p10 = scmp.ne.s32.totalorder %s933_s27, %s775_s5  ;;  %p777_p11 = pneg %p937_p8 }
  0x11   : > { %p781_p0 = scmp.lt.u32.totalorder %s933_s27, %s1060_s1  ;;  %p782_p1 = scmp.lt.u32.totalorder %s780_s8, %s775_s5 }
  0x12   : > { %p778_p12 = pnand %p777_p11, %p776_p10  ;;  %p784_p3 = scmp.lt.u32.totalorder %s775_s5, %s933_s27 }
  0x13   : > { %p783_p2 = por %p782_p1, %p781_p0 }
  0x14   : > { %p779_p13 = pneg %p778_p12 }
  0x15   : > { %p785_p4 = por %p784_p3, %p783_p2 }
  0x17   : > { %p786_p5 = pnand %p785_p4, %p779_p13 }
  0x19   : > { %789 = shalt.err (!%p786_p5)
}
  0x1a   : > { %s790_s11 = scalar_lea.vmem %s935_s29, 2048  ;;  %s857_s12 = smov [#allocation6]  }
  0x1b   : > { %p791_p6 = scmp.ne.s32.totalorder %s935_s29, %s790_s11  ;;  %s795_s18 = sshll.u32 %s857_s12, 4  ;;  %s796_s18 = int_to_ptr.vmem [resolvable:$false] %s795_s18 }
  0x1c   : > { %s797_s19 = scalar_lea.vmem %s796_s18, 4096  ;;  %p798_p9 = scmp.lt.s32.totalorder %s935_s29, %s796_s18 }
  0x1d   : > { %p793_p10 = pnand %p791_p6, %p777_p11  ;;  %p799_p0 = scmp.lt.s32.totalorder %s797_s19, %s790_s11 }
  0x1f   : > { %p794_p12 = pneg %p793_p10  ;;  %p800_p1 = por %p799_p0, %p798_p9 }
  0x21   : > { %p801_p2 = pnand %p800_p1, %p794_p12 }
  0x23   : > { %804 = shalt.err (!%p801_p2)
}
  0x24   : > { %s858_s22 = smov 128   ;;  %s859_s23 = smov 8  }
  0x25   : > { %711 = dma.hbm_to_vmem [thread:$0]  (!%p937_p8), %s933_s27, 2048, %s935_s29, %s942_s4, %s858_s22, %s858_s22, %s859_s23  }
  0x26   : > { %p149_p11 = scmp.lt.s32.totalorder %s855_s15, 4  ;;  %p1065_p13 = scmp.ge.s32.totalorder %s855_s15, 1 }
  0x28   : > { %p150_p3 = pnand %p1065_p13, %p149_p11 }
  0x29   : > { %s155_s24 = sand.u32 (!%p150_p3), 1, %s847_s13  }
  0x2a   : > { %153 = sbr.rel (%p150_p3) target bundleno = 1200 (0x4b0), region = 32  ;;  %s538_s25 = sshll.u32 (!%p150_p3), %s155_s24, 7 }
  0x2b   : > { %s156_s26 = scalar_lea.sflag (!%p150_p3), [#allocation7], %s155_s24  ;;  %s974_s28 = scalar_lea.vmem (!%p150_p3), [#allocation6], %s538_s25 }
  0x31   : > { %834 = dma.done.wait (%p924_p7), %s156_s26, 2048  }
  0x32   : > { %836 = vsyncadd (%p924_p7), %s156_s26, 4294965248  ;;  %v983_v0 = vld [vmem:[%s1061_s2] sm:$0xff]  ;;  %p539_p8 = scmp.ne.s32.totalorder %s907_s16, 0 }
  0x33   : > { %v183_v1 = vld [vmem:[%s1059_s0] sm:$0xff] (!%p539_p8)  ;;  %vm191_vm0 = vcmask (!%p539_p8), 7168   ;;  %v860_v3 = vmov (!%p539_p8), -128.0   ;;  %v861_v4 = vmov (!%p539_p8), 0.0  }
  0x34   : > { %182 = sbr.rel (%p539_p8) target bundleno = 212 (0xd4), region = 40  ;;  %v184_v2 = vmul.f32 (!%p539_p8), %v183_v1, %v183_v1  ;;  %192 = vst.msk [vmem:[#allocation3] sm:$0xff] (!%p539_p8), %vm191_vm0, %v860_v3  ;;  %193 = vst.msk [vmem:[#allocation4] sm:$0xff] (!%p539_p8), %vm191_vm0, %v861_v4 }
  0x35   : > { %194 = vst.msk [vmem:[#allocation5] sm:$0xff] (!%p539_p8), %vm191_vm0, %v861_v4 }
  0x36   : > { %185 = vadd.xlane.f32.xlu0 (!%p539_p8), %v184_v2 }
  0xc3   : > { %v186_v5 = vpop.xlane.xlu0 %185 }
  0xc4   : > { %v187_v6 = vmax.f32 %v186_v5, 1e-24 }
  0xc6   : > { %757 = vrsqrt.f32 %v187_v6 }
  0xd0   : > { %v758_v7 = vpop.eup %757 }
  0xd1   : > { %v189_v8 = vmul.f32 %v758_v7, %v183_v1 }
  0xd3   : > { %190 = vst [vmem:[#allocation2] sm:$0xff] %v189_v8 }
  0xd4 PF: > { %v195_v9 = vld [vmem:[%s974_s28] sm:$0xff]  ;;  %v196_v10 = vld [vmem:[%s974_s28 + $0x8] sm:$0xff]  ;;  %v862_v11 = vmov 0.0|0.0   ;;  %v197_v14 = vld [vmem:[%s974_s28 + $0x10] sm:$0xff]  ;;  %vm863_vm1 = vmmov 0   ;;  %v864_v17 = vmov 0.0   ;;  %v370_v5 = vlaneseq }
  0xd5   : > { %652 = vmatprep.subr.bf16.mxu0 %v862_v11  ;;  %v211_v12 = vmul.f32 %v195_v9, %v195_v9  ;;  %v212_v13 = vmul.f32 %v196_v10, %v196_v10  ;;  %676 = vmatprep.subr.bf16.mxu1 %v862_v11  ;;  %v198_v15 = vld [vmem:[%s974_s28 + $0x18] sm:$0xff]  ;;  %v677_v16 = vpack.c.bf16 %v196_v10, %v195_v9  ;;  %v865_v21 = vmov 0   ;;  %v199_v24 = vld [vmem:[%s974_s28 + $0x20] sm:$0xff]  ;;  %v200_v25 = vld [vmem:[%s974_s28 + $0x28] sm:$0xff]  ;;  %s541_s21 = sshll.u32 %s907_s16, 7  ;;  %p542_p7 = scmp.ne.s32.totalorder %s907_s16, 2 }
  0xd6   : > { %614 = vmatprep.mubr.msk.f32.mxu0 %vm863_vm1, %v864_v17  ;;  %649 = vmatprep.mubr.msk.f32.mxu1 %vm863_vm1, %v864_v17  ;;  %v213_v19 = vmul.f32 %v197_v14, %v197_v14  ;;  %v214_v20 = vmul.f32 %v198_v15, %v198_v15  ;;  %v680_v22 = vpack.c.bf16 %v198_v15, %v197_v14  ;;  %vm386_vm2 = vcmp.ne.s32.totalorder %v983_v0, 4294967295  ;;  %v201_v31 = vld [vmem:[%s974_s28 + $0x30] sm:$0xff]  ;;  %v202_v32 = vld [vmem:[%s974_s28 + $0x38] sm:$0xff]  ;;  %v203_v37 = vld [vmem:[%s974_s28 + $0x40] sm:$0xff] }
  0xd7   : > { %v653_v18 = vpack.c.bf16 %v212_v13, %v211_v12  ;;  %678 = vmatpush3.bf16.xpose.msra.mxu1 %v677_v16  ;;  %759 = vset.pattern.permute.xlu0 %v865_v21  ;;  %v387_v26 = vsel %vm386_vm2, 1, %v865_v21  ;;  %v215_v27 = vmul.f32 %v199_v24, %v199_v24  ;;  %v216_v28 = vmul.f32 %v200_v25, %v200_v25  ;;  %v204_v38 = vld [vmem:[%s974_s28 + $0x48] sm:$0xff]  ;;  %v205_v43 = vld [vmem:[%s974_s28 + $0x50] sm:$0xff]  ;;  %v206_v44 = vld [vmem:[%s974_s28 + $0x58] sm:$0xff] }
  0xd8   : > { %679 = vmatprep.subr.bf16.mxu1 %v862_v11  ;;  %383 = vperm.xlu0 %759, %v983_v0   ;;  %v656_v23 = vpack.c.bf16 %v214_v20, %v213_v19  ;;  %v683_v29 = vpack.c.bf16 %v200_v25, %v199_v24  ;;  %v217_v33 = vmul.f32 %v201_v31, %v201_v31  ;;  %v207_v49 = vld [vmem:[%s974_s28 + $0x60] sm:$0xff]  ;;  %v208_v50 = vld [vmem:[%s974_s28 + $0x68] sm:$0xff]  ;;  %v209_v55 = vld [vmem:[%s974_s28 + $0x70] sm:$0xff]  ;;  %v866_v62 = vmov 1.0  }
  0xd9   : > { %654 = vmatpush3.bf16.xpose.msra.mxu0 %v653_v18  ;;  %760 = vset.pattern.permute.xlu1 %v865_v21  ;;  %v659_v30 = vpack.c.bf16 %v216_v28, %v215_v27  ;;  %v218_v34 = vmul.f32 %v202_v32, %v202_v32  ;;  %v686_v35 = vpack.c.bf16 %v202_v32, %v201_v31  ;;  %v210_v56 = vld [vmem:[%s974_s28 + $0x78] sm:$0xff]  ;;  %v371_v7 = vshrl.u32 %v370_v5, 7 }
  0xda   : > { %655 = vmatprep.subr.bf16.mxu0 %v862_v11  ;;  %v219_v39 = vmul.f32 %v203_v37, %v203_v37  ;;  %v220_v40 = vmul.f32 %v204_v38, %v204_v38  ;;  %v689_v41 = vpack.c.bf16 %v204_v38, %v203_v37  ;;  %v221_v45 = vmul.f32 %v205_v43, %v205_v43  ;;  %v299_v61 = vld [vmem:[#allocation2] sm:$0xff]  ;;  %v393_v20 = vld [vmem:[#allocation5] sm:$0xff] }
  0xdb   : > { %v662_v36 = vpack.c.bf16 %v218_v34, %v217_v33  ;;  %v222_v46 = vmul.f32 %v206_v44, %v206_v44  ;;  %v692_v47 = vpack.c.bf16 %v206_v44, %v205_v43  ;;  %v223_v51 = vmul.f32 %v207_v49, %v207_v49  ;;  %v408_v33 = vld [vmem:[#allocation4] sm:$0xff] }
  0xdc   : > { %389 = vperm.xlu0 %759, %v387_v26   ;;  %v665_v42 = vpack.c.bf16 %v220_v40, %v219_v39  ;;  %v224_v52 = vmul.f32 %v208_v50, %v208_v50  ;;  %v695_v53 = vpack.c.bf16 %v208_v50, %v207_v49  ;;  %v225_v57 = vmul.f32 %v209_v55, %v209_v55 }
  0xdd   : > { %v668_v48 = vpack.c.bf16 %v222_v46, %v221_v45  ;;  %v226_v58 = vmul.f32 %v210_v56, %v210_v56  ;;  %v698_v59 = vpack.c.bf16 %v210_v56, %v209_v55  ;;  %v378_v8 = vand.u32 127, %v370_v5 }
  0xde   : > { %v671_v54 = vpack.c.bf16 %v224_v52, %v223_v51  ;;  %v380_v9 = vstv %s541_s21  ;;  %v372_v10 = vsub.s32 0, %v371_v7  ;;  %vm398_vm8 = vcmask 7168  }
  0xdf   : > { %681 = vmatpush3.bf16.xpose.msra.mxu1 %v680_v22  ;;  %v674_v60 = vpack.c.bf16 %v226_v58, %v225_v57  ;;  %v404_v22 = vld [vmem:[#allocation3] sm:$0xff] }
  0xe0   : > { %682 = vmatprep.subr.bf16.mxu1 %v862_v11 }
  0xe1   : > { %657 = vmatpush3.bf16.xpose.msra.mxu0 %v656_v23 }
  0xe2   : > { %658 = vmatprep.subr.bf16.mxu0 %v862_v11 }
  0xe7   : > { %684 = vmatpush3.bf16.xpose.msra.mxu1 %v683_v29 }
  0xe8   : > { %685 = vmatprep.subr.bf16.mxu1 %v862_v11 }
  0xe9   : > { %660 = vmatpush3.bf16.xpose.msra.mxu0 %v659_v30 }
  0xea   : > { %661 = vmatprep.subr.bf16.mxu0 %v862_v11 }
  0xef   : > { %687 = vmatpush3.bf16.xpose.msra.mxu1 %v686_v35 }
  0xf0   : > { %688 = vmatprep.subr.bf16.mxu1 %v862_v11 }
  0xf1   : > { %663 = vmatpush3.bf16.xpose.msra.mxu0 %v662_v36 }
  0xf2   : > { %664 = vmatprep.subr.bf16.mxu0 %v862_v11 }
  0xf7   : > { %690 = vmatpush3.bf16.xpose.msra.mxu1 %v689_v41 }
  0xf8   : > { %691 = vmatprep.subr.bf16.mxu1 %v862_v11 }
  0xf9   : > { %666 = vmatpush3.bf16.xpose.msra.mxu0 %v665_v42 }
  0xfa   : > { %667 = vmatprep.subr.bf16.mxu0 %v862_v11 }
  0xff   : > { %693 = vmatpush3.bf16.xpose.msra.mxu1 %v692_v47 }
 0x100   : > { %694 = vmatprep.subr.bf16.mxu1 %v862_v11 }
 0x101   : > { %669 = vmatpush3.bf16.xpose.msra.mxu0 %v668_v48 }
 0x102   : > { %670 = vmatprep.subr.bf16.mxu0 %v862_v11 }
 0x107   : > { %696 = vmatpush3.bf16.xpose.msra.mxu1 %v695_v53 }
 0x108   : > { %697 = vmatprep.subr.bf16.mxu1 %v862_v11 }
 0x109   : > { %672 = vmatpush3.bf16.xpose.msra.mxu0 %v671_v54 }
 0x10a   : > { %673 = vmatprep.subr.bf16.mxu0 %v862_v11  ;;  %v381_v11 = vadd.s32 %v380_v9, %v378_v8 }
 0x10c   : > { %vm401_vm6 = vcmp.ge.s32.totalorder %v381_v11, 300 }
 0x10f   : > { %699 = vmatpush3.bf16.xpose.msra.mxu1 %v698_v59 }
 0x111   : > { %675 = vmatpush3.bf16.xpose.msra.mxu0 %v674_v60 }
 0x116   : > { %650 = vmatmul.mubr.f32.vlgmr.msra.gmra.mrb[0].mxu1 %v299_v61 }
 0x118   : > { %615 = vmatmul.mubr.f32.vlgmr.msra.gmra.mrb[0].mxu0 %v866_v62 }
 0x157   : > { %v384_v6 = vpop.permute.xlu0 %383 }
 0x158   : > { %vm385_vm3 = vcmp.eq.s32.totalorder %v381_v11, %v384_v6 }
 0x15b   : > { %v390_v12 = vpop.permute.xlu0 %389 }
 0x15c   : > { %vm391_vm4 = vcmp.eq.s32.totalorder %v390_v12, 1 }
 0x15d   : > { %vm392_vm5 = vmand %vm385_vm3, %vm391_vm4 }
 0x15e   : > { %vm402_vm7 = vmor %vm392_vm5, %vm401_vm6 }
 0x1e9   : > { %v366_v63 = vpop.f32.mrb[0].mxu1 }
 0x1ea   : > { %v651_v2 = vpop.f32.mrb[1].mxu1 }
 0x1eb   : > { %v293_v1 = vpop.f32.mrb[0].mxu0 }
 0x1ec   : > { %v297_v3 = vmax.f32 %v293_v1, 1e-24  ;;  %v616_v4 = vpop.f32.mrb[1].mxu0 }
 0x1ee   : > { %761 = vrsqrt.f32 %v297_v3 }
 0x1f8   : > { %v762_v13 = vpop.eup %761 }
 0x1f9   : > { %v373_v14 = vrot.slane %v762_v13, %v372_v10 }
 0x1fb   : > { %v374_v15 = vmul.f32 %v373_v14, %v366_v63 }
 0x1fd   : > { %v540_v16 = vclamps-f32 %v374_v15, 1.0 }
 0x1ff   : > { %v394_v17 = vsel %vm392_vm5, %v540_v16, 0.0  ;;  %v400_v18 = vmul.f32 64.0, %v540_v16 }
 0x200   : > { %395 = vadd.xlane.f32.xlu0 %v394_v17 }
 0x201   : > { %v403_v19 = vsel %vm402_vm7, -1e+30, %v400_v18 }
 0x202   : > { %405 = vmax.xlane.f32.xlu1 %v403_v19 }
 0x28d   : > { %v396_v21 = vpop.xlane.xlu0 %395 }
 0x28e   : > { %v397_v23 = vadd.f32 %v396_v21, %v393_v20 }
 0x28f   : > { %v406_v24 = vpop.xlane.xlu1 %405 }
 0x290   : > { %399 = vst.msk [vmem:[#allocation5] sm:$0xff] %vm398_vm8, %v397_v23  ;;  %v407_v25 = vmax.f32 %v404_v22, %v406_v24 }
 0x292   : > { %v409_v26 = vsub.f32 %v404_v22, %v407_v25  ;;  %425 = vst.msk [vmem:[#allocation3] sm:$0xff] %vm398_vm8, %v407_v25  ;;  %415 = vperm.xlu1 %760, %v407_v25  }
 0x294   : > { %v410_v31 = vmul.f32 1.442695, %v409_v26 }
 0x297   : > { %v430_v37 = vld [vmem:[#allocation5] sm:$0xff] (!%p542_p7) }
 0x298   : > { %v431_v38 = vmul.f32 (!%p542_p7), %v430_v37, %v430_v37  ;;  %v441_v45 = vmul.f32 (!%p542_p7), 0.87758255, %v430_v37 }
 0x299   : > { %v445_v49 = vld [vmem:[#allocation3] sm:$0xff] (!%p542_p7) }
 0x29a   : > { %v432_v39 = vsub.f32 (!%p542_p7), 1.0, %v431_v38 }
 0x29c   : > { %v433_v40 = vmax.f32 (!%p542_p7), %v432_v39, 0.0 }
 0x29e   : > { %vm436_vm9 = vcmp.eq.f32.partialorder (!%p542_p7), %v433_v40, inf  ;;  %v439_v42 = vand.u32 (!%p542_p7), 2147483648, %v433_v40  ;;  %vm438_vm10 = vcmp.eq.f32.partialorder (!%p542_p7), %v433_v40, 0.0 }
 0x311   : > { %v416_v27 = vpop.permute.xlu1 %415 }
 0x312   : > { %v418_v28 = vsub.f32 %v403_v19, %v416_v27 }
 0x314   : > { %v419_v29 = vmul.f32 1.442695, %v418_v28 }
 0x316   : > { %763 = vpow2.f32 %v419_v29 }
 0x317   : > { %765 = vpow2.f32 %v410_v31 }
 0x318   : > { %767 = vrsqrt.f32 (!%p542_p7), %v433_v40 }
 0x320   : > { %v764_v30 = vpop.eup %763 }
 0x321   : > { %421 = vadd.xlane.f32.xlu1 %v764_v30  ;;  %v766_v32 = vpop.eup %765 }
 0x322   : > { %v412_v34 = vmul.f32 %v766_v32, %v408_v33  ;;  %v768_v41 = vpop.eup (!%p542_p7), %767 }
 0x323   : > { %v435_v43 = vmul.f32 (!%p542_p7), %v768_v41, %v433_v40 }
 0x325   : > { %v437_v44 = vsel (!%p542_p7), %vm436_vm9, %v433_v40, %v435_v43 }
 0x326   : > { %v440_v46 = vsel (!%p542_p7), %vm438_vm10, %v439_v42, %v437_v44 }
 0x327   : > { %v442_v47 = vmul.f32 (!%p542_p7), 0.47942555, %v440_v46 }
 0x329   : > { %v443_v48 = vsub.f32 (!%p542_p7), %v441_v45, %v442_v47 }
 0x32b   : > { %v444_v50 = vmul.f32 (!%p542_p7), 64.0, %v443_v48 }
 0x32d   : > { %v446_v51 = vmax.f32 (!%p542_p7), %v445_v49, %v444_v50 }
 0x32f   : > { %v448_v52 = vsub.f32 (!%p542_p7), %v445_v49, %v446_v51  ;;  %v452_v53 = vsub.f32 (!%p542_p7), %v444_v50, %v446_v51 }
 0x331   : > { %v449_v54 = vmul.f32 (!%p542_p7), 1.442695, %v448_v52  ;;  %v453_v55 = vmul.f32 (!%p542_p7), 1.442695, %v452_v53 }
 0x333   : > { %769 = vpow2.f32 (!%p542_p7), %v449_v54 }
 0x334   : > { %771 = vpow2.f32 (!%p542_p7), %v453_v55 }
 0x33d   : > { %v770_v57 = vpop.eup (!%p542_p7), %769 }
 0x33e   : > { %v772_v58 = vpop.eup (!%p542_p7), %771 }
 0x3ab   : > { %429 = sbr.rel (%p542_p7) target bundleno = 1185 (0x4a1), region = 44 }
 0x3ae   : > { %v422_v35 = vpop.xlane.xlu1 %421 }
 0x3af   : > { %v423_v36 = vadd.f32 %v422_v35, %v412_v34 }
 0x3b1   : > { %424 = vst.msk [vmem:[#allocation4] sm:$0xff] %vm398_vm8, %v423_v36 }
 0x3b8   : > { %v447_v56 = vld [vmem:[#allocation4] sm:$0xff] }
 0x3b9   : > { %v451_v59 = vmul.f32 %v770_v57, %v447_v56 }
 0x3bb   : > { %v455_v60 = vadd.f32 %v772_v58, %v451_v59 }
 0x3bd   : > { %773 = vlog2.f32 %v455_v60 }
 0x3c7   : > { %v774_v61 = vpop.eup %773 }
 0x3c8   : > { %v457_v62 = vmul.f32 0.6931472, %v774_v61 }
 0x3ca   : > { %v458_v63 = vadd.f32 %v457_v62, %v446_v51 }
 0x3cc   : > { %v459_v1 = vsub.f32 %v458_v63, %v444_v50 }
 0x3ce   : > { %v460_v2 = vmin.f32 %v459_v1, 69.07755 }
 0x3d0   : > { %v461_v3 = vsel %vm386_vm2, %v460_v2, 69.07755 }
 0x3d1   : > { %v462_v4 = vsel %vm398_vm8, %v461_v3, 0.0 }
 0x3d2   : > { %463 = vadd.xlane.f32.xlu0 %v462_v4 }
 0x45f   : > { %v464_v5 = vpop.xlane.xlu0 %463 }
 0x460   : > { %v465_v6 = vrot.slane %v464_v5, 4 }
 0x462   : > { %v466_v7 = vadd.f32 %v465_v6, %v464_v5 }
 0x464   : > { %v467_v8 = vrot.slane %v466_v7, 2 }
 0x466   : > { %v468_v9 = vadd.f32 %v467_v8, %v466_v7 }
 0x468   : > { %v469_v10 = vrot.slane %v468_v9, 1 }
 0x46a   : > { %v470_v11 = vadd.f32 %v469_v10, %v468_v9 }
 0x46c   : > { %700 = vpush %v470_v11 }
 0x49d   : > { %s701_s29 = spop %700 }
 0x49e   : > { %s472_s30 = smul.f32 0.125, %s701_s29 }
 0x4a0   : > { %474 = sst [smem:[#allocation9]] %s472_s30 }
 0x4a1 PF: > { %p713_p9 = scmp.eq.s32.totalorder %s907_s16, 2  ;;  %s805_s8 = scalar_lea.hbm %s1062_s3, 16 }
 0x4a2   : > { %p806_p4 = scmp.ne.s32.totalorder %s1062_s3, %s805_s8  ;;  %p811_p10 = scmp.lt.u32.totalorder %s805_s8, %s1062_s3 }
 0x4a4   : > { %p807_p5 = pnand %p806_p4, %p713_p9 }
 0x4a6   : > { %p808_p6 = pneg %p807_p5 }
 0x4a8   : > { %p813_p12 = pnand %p811_p10, %p808_p6 }
 0x4aa   : > { %816 = shalt.err (!%p813_p12)
}
 0x4ab   : > { %s867_s18 = smov [#allocation9]  }
 0x4ac   : > { %705 = dma.smem_to_hbm (%p713_p9), %s867_s18, 16, %s1062_s3, [#allocation8]  }
 0x4ad   : > { %838 = dma.done.wait (%p713_p9), [#allocation8], 16  }
 0x4ae   : > { %840 = vsyncadd (%p713_p9), [#allocation8], 4294967280 }
 0x4af   : > { %488 = sfence }
 0x4b0 PF: > { %p14_p0 = scmp.ge.s32.totalorder %s910_s17, 5   ;;  %s1066_s12 = smov %s847_s13 }
 0x4b1   : > { %s1067_s13 = smov %s851_s14  ;;  %s1068_s14 = smov %s920_s20 }
 0x4b2   : > { %s1069_s15 = smov %s910_s17  ;;  %16 = sbr.rel (!%p14_p0) target bundleno = 4 (0x4), region = 78 }
 0x4b9   :  { %494 = vsyncpa [#allocation7], 1 }
 0x4ba   :  { %496 = vsyncpa [#allocation7 + $0x1], 1 }
 0x4bb   :  { %497 = vsyncpa [#allocation8], 1 }
 0x4bc   :  { %499 = vsyncpa [#allocation8 + $0x1], 1 }

</bundles_post_ra>
